<compile_context>
chip_gen: v7x
topology: tpu7x:2x2x1
jax: 0.10.0
libtpu: 0.0.40
codegen_flags: <defaults>
</compile_context>

<pallas_src>
import jax
import jax.numpy as jnp
from jax.experimental import pallas as pl
from jax.experimental.pallas import tpu as pltpu

_TARGET_CHUNK_BYTES = 8 * 1024 * 1024   # ~8 MiB per DMA chunk
_MIN_SPLIT_BYTES = 4 * 1024 * 1024      # >= this -> force >=2 chunks (v7x 2 TCs)


def _plan_chunks(shape, itemsize, target_chunk_bytes):
    """Static chunking plan along the leading axis: (nchunks, chunk_rows, tail_rows)."""
    rows = shape[0]
    row_elems = 1
    for d in shape[1:]:
        row_elems *= d
    row_bytes = max(1, row_elems * itemsize)
    total_bytes = rows * row_bytes

    chunk_rows = max(1, min(rows, target_chunk_bytes // row_bytes))
    if total_bytes >= _MIN_SPLIT_BYTES and rows >= 2:
        # At least 2 chunks so the "parallel" grid axis can shard across both
        # v7x TensorCores (each gets its own HBM read/write DMA stream).
        chunk_rows = min(chunk_rows, pl.cdiv(rows, 2))

    nchunks = pl.cdiv(rows, chunk_rows)
    tail_rows = rows - (nchunks - 1) * chunk_rows
    return nchunks, chunk_rows, tail_rows


def _make_identity_dma_kernel(nchunks, chunk_rows, tail_rows):
    """Kernel: per grid step, one HBM->HBM DMA of a leading-axis chunk."""
    if nchunks == 1:
        def kernel_single(x_hbm, o_hbm, sem):
            cp = pltpu.make_async_copy(x_hbm, o_hbm, sem)
            cp.start()
            cp.wait()
        return kernel_single

    def kernel_chunked(x_hbm, o_hbm, sem):
        i = pl.program_id(0)

        @pl.when(i < nchunks - 1)
        def _copy_body():
            start = i * chunk_rows
            cp = pltpu.make_async_copy(
                x_hbm.at[pl.ds(start, chunk_rows)],
                o_hbm.at[pl.ds(start, chunk_rows)],
                sem,
            )
            cp.start()
            cp.wait()

        @pl.when(i == nchunks - 1)
        def _copy_tail():
            start = (nchunks - 1) * chunk_rows   # static
            cp = pltpu.make_async_copy(
                x_hbm.at[pl.ds(start, tail_rows)],
                o_hbm.at[pl.ds(start, tail_rows)],
                sem,
            )
            cp.start()
            cp.wait()

    return kernel_chunked


def _identity_copy(x, *, target_chunk_bytes=_TARGET_CHUNK_BYTES):
    """Materialize a distinct output buffer via direct HBM->HBM DMA."""
    if x.size == 0:
        return x
    orig_shape = x.shape
    if x.ndim == 0:
        x = jnp.reshape(x, (1,))   # trivial 1-element view for leading-axis plan

    itemsize = jnp.dtype(x.dtype).itemsize
    nchunks, chunk_rows, tail_rows = _plan_chunks(x.shape, itemsize, target_chunk_bytes)
    total_bytes = x.size * itemsize

    out = pl.pallas_call(
        _make_identity_dma_kernel(nchunks, chunk_rows, tail_rows),
        out_shape=jax.ShapeDtypeStruct(x.shape, x.dtype),
        grid=(nchunks,),
        in_specs=[pl.BlockSpec(memory_space=pl.ANY)],
        out_specs=pl.BlockSpec(memory_space=pl.ANY),
        scratch_shapes=[pltpu.SemaphoreType.DMA(())],
        compiler_params=pltpu.CompilerParams(
            dimension_semantics=("parallel",),
        ),
        cost_estimate=pl.CostEstimate(
            flops=0,
            transcendentals=0,
            bytes_accessed=2 * total_bytes,
        ),
    )(x)
    return jnp.reshape(out, orig_shape) if out.shape != orig_shape else out


def fake_layer(x):
    """FakeLayer.forward (identity) -- returns a distinct buffer via HBM->HBM DMA."""
    return _identity_copy(x)


def fake_layer_inplace(x):
    """Aliased / in-place FakeLayer forward: pure no-op, no kernel, 0 HBM bytes.

    The module's forward is `return input`; under jit with donation XLA simply
    aliases the input buffer to the output.
    """
    return x


if __name__ == "__main__":
    key = jax.random.PRNGKey(0)
    shape = (2, 4, 16, 16)  # small NCHW input, consistent with the module
    x = jax.random.normal(key, shape, dtype=jnp.float32)

    # Safe path (distinct output buffer via single HBM->HBM DMA).
    y = fake_layer(x)
    jax.block_until_ready(y)
    assert y.shape == x.shape and y.dtype == x.dtype
    assert bool(jnp.all(y == x))

    # Ragged element count (not a multiple of 128) + bf16: same direct-DMA path,
    # no pad/slice, no reshape.
    x_ragged = jax.random.normal(jax.random.PRNGKey(0), (2, 3, 5, 7), dtype=jnp.bfloat16)
    y_ragged = fake_layer(x_ragged)
    jax.block_until_ready(y_ragged)
    assert y_ragged.shape == x_ragged.shape and y_ragged.dtype == x_ragged.dtype
    assert bool(jnp.all(y_ragged == x_ragged))

    # Force the multi-chunk path (parallel grid + unequal tail chunk) with a
    # small tensor by shrinking the per-chunk byte target.
    x_multi = jax.random.normal(jax.random.PRNGKey(0), (10, 4, 16, 16), dtype=jnp.float32)
    y_multi = _identity_copy(x_multi, target_chunk_bytes=16 * 1024)
    jax.block_until_ready(y_multi)
    assert bool(jnp.all(y_multi == x_multi))

    # In-place / aliased variant: no kernel, no traffic.
    x2 = jax.random.normal(key, shape, dtype=jnp.float32)
    y2 = fake_layer_inplace(x2)
    jax.block_until_ready(y2)
    assert y2.shape == shape and y2.dtype == jnp.float32
    assert bool(jnp.all(y2 == x))  # same PRNG key => same expected values

    print("KERNEL_OK")
</pallas_src>

<mosaic_0001>
module attributes {stable_mosaic.version = 11 : i64} {
  func.func @kernel_single(%arg0: i32, %arg1: memref<2x4x16x16xf32, #tpu.memory_space<any>>, %arg2: memref<2x4x16x16xf32, #tpu.memory_space<any>>, %arg3: memref<!tpu.dma_semaphore, #tpu.memory_space<semaphore_mem>>) attributes {dimension_semantics = [#tpu.dimension_semantics<parallel>], iteration_bounds = array<i64: 1>, scalar_prefetch = 0 : i64, scratch_operands = 1 : i64, tpu.core_type = #tpu.core_type<tc>, window_params = [{}, {}]} {
    tpu.enqueue_dma source(%arg1 : memref<2x4x16x16xf32, #tpu.memory_space<any>>) target(%arg2 : memref<2x4x16x16xf32, #tpu.memory_space<any>>) target_semaphore(%arg3 : memref<!tpu.dma_semaphore, #tpu.memory_space<semaphore_mem>>)
    tpu.wait_dma2 semaphore(%arg3 : memref<!tpu.dma_semaphore, #tpu.memory_space<semaphore_mem>>) src(%arg1 : memref<2x4x16x16xf32, #tpu.memory_space<any>>) dst(%arg2 : memref<2x4x16x16xf32, #tpu.memory_space<any>>)
    return
  }
}

</mosaic_0001>

<bundles_post_ra>
// kernel: tpu_custom_call.1
= control target key start
LH: loop header
LB: loop body
LE: loop exit
PB: predicated region body
PF: predicated region fallthrough
CT: control target
= control target key end

     0   :  { %s36_s6 = smov [#allocation2]   ;;  %s37_s7 = smov [#allocation3]   ;;  %s55_s0 = inlined_call_operand.hbm [shape: f32[2,4,16,16], index: 0, kind: input, shape index: {}]   ;;  %s56_s1 = inlined_call_operand.hbm [shape: f32[2,4,16,16], index: 1, kind: output, shape index: {}]  }
   0x1   :  { %s38_s8 = smov 0  }
   0x2   :  { %18 = dma.general %s55_s0, 2048, %s56_s1, %s36_s6, %s37_s7, [#allocation4], %s38_s8, 0  }
   0x3   :  { %34 = dma.done.wait [#allocation2], 2048 }
   0x4   :  { %35 = vsyncadd [#allocation2], 4294965248 }
   0x5   :  { %24 = vsyncmov [#allocation2] }
   0x8   :  { %s25_s13 = vpop.sfrf %24 }
   0x9   :  { %p30_p0 = scmp.ne.s32.totalorder %s25_s13, 0 }
   0xb   :  { %29 = shalt.err (%p30_p0)  }

</bundles_post_ra>
